<compile_context>
chip_gen: v7x
topology: tpu7x:2x2x1
jax: 0.10.0
libtpu: 0.0.40
codegen_flags: <defaults>
</compile_context>

<pallas_src>
import jax
import jax.numpy as jnp
from jax.experimental import pallas as pl
from jax.experimental.pallas import tpu as pltpu


def attdot_kernel(q_ref, y_ref, att_ref, sim_ref):
    # q_ref:   (bblk, tq, tk)
    # y_ref:   (bblk, tty, tk)
    # att_ref: (bblk, tq, tty)   resident across the k (D) grid axis
    # sim_ref: (bblk, tq, 1)     resident across the j (Ty) and k (D) axes
    j = pl.program_id(2)
    k = pl.program_id(3)
    nk = pl.num_programs(3)

    # Partial contraction over this D chunk (f32 accumulation on the MXU).
    partial = jnp.einsum(
        "bqd,bkd->bqk",
        q_ref[...],
        y_ref[...],
        preferred_element_type=jnp.float32,
    )

    # Accumulate directly into the resident att output block (f32 output, so
    # accumulation precision matches PyTorch's f32 bmm).
    @pl.when(k == 0)
    def _():
        att_ref[...] = partial.astype(att_ref.dtype)

    @pl.when(k > 0)
    def _():
        att_ref[...] = (att_ref[...] + partial).astype(att_ref.dtype)

    last_k = k == nk - 1

    # Running max over Ty tiles, kept in the resident sim output block.
    # max over the lane axis keeps tq on sublanes -> no transpose needed for
    # the (bblk, tq, 1) store.
    @pl.when(jnp.logical_and(last_k, j == 0))
    def _():
        sim_ref[...] = jnp.max(att_ref[...], axis=-1, keepdims=True).astype(
            sim_ref.dtype
        )

    @pl.when(jnp.logical_and(last_k, j > 0))
    def _():
        sim_ref[...] = jnp.maximum(
            sim_ref[...],
            jnp.max(att_ref[...], axis=-1, keepdims=True).astype(sim_ref.dtype),
        )


def _pick_tile(dim, target, align):
    """Largest t <= target with dim % t == 0 and t % align == 0, else full dim.

    Full-extent blocks are always legal w.r.t. the (8,128) constraint; the
    fallback only costs VMEM for awkward (non-factorable) dims.
    """
    if dim <= target:
        return dim
    for t in range(target, 0, -1):
        if t % align == 0 and dim % t == 0:
            return t
    return dim


def _pick_bblk(batch, per_batch_tile_bytes, budget_bytes=4 * 1024 * 1024):
    """Fold several batch elements per grid step when tiles are tiny."""
    if per_batch_tile_bytes <= 0:
        return 1
    cap = max(1, budget_bytes // per_batch_tile_bytes)
    best = 1
    for d in range(1, batch + 1):
        if batch % d == 0 and d <= cap:
            best = d
    return best


def att_dot(query, y, *, tq_target=512, tty_target=1024, tk_target=512):
    """Pallas implementation of AttDot.forward.

    query: (B, Tq, D) float32
    y:     (B, Ty, D) float32
    returns (att (B, Tq, Ty), sim (B, 1, Tq))
    """
    B, Tq, D = query.shape
    By, Ty, Dy = y.shape
    assert B == By and D == Dy, "query/y shape mismatch"

    tq = _pick_tile(Tq, tq_target, 8)      # sublane-aligned
    tty = _pick_tile(Ty, tty_target, 128)  # lane-dense att writeback
    tk = _pick_tile(D, tk_target, 128)

    itemsize = jnp.dtype(query.dtype).itemsize
    per_batch_tile_bytes = (tq * tk + tty * tk + tq * tty + tq) * itemsize
    bblk = _pick_bblk(B, per_batch_tile_bytes)

    grid = (B // bblk, Tq // tq, Ty // tty, D // tk)

    att, sim_raw = pl.pallas_call(
        attdot_kernel,
        out_shape=(
            jax.ShapeDtypeStruct((B, Tq, Ty), query.dtype),
            jax.ShapeDtypeStruct((B, Tq, 1), query.dtype),
        ),
        grid_spec=pltpu.PrefetchScalarGridSpec(
            num_scalar_prefetch=0,
            grid=grid,
            in_specs=[
                pl.BlockSpec((bblk, tq, tk), lambda b, i, j, k: (b, i, k)),
                pl.BlockSpec((bblk, tty, tk), lambda b, i, j, k: (b, j, k)),
            ],
            out_specs=[
                pl.BlockSpec((bblk, tq, tty), lambda b, i, j, k: (b, i, j)),
                pl.BlockSpec((bblk, tq, 1), lambda b, i, j, k: (b, i, 0)),
            ],
        ),
        compiler_params=pltpu.CompilerParams(
            # Ty and D axes carry accumulators (sim / att) -> arbitrary.
            dimension_semantics=("parallel", "parallel", "arbitrary", "arbitrary"),
            vmem_limit_bytes=48 * 1024 * 1024,
        ),
    )(query, y)

    # Tiny (B, Tq, 1) -> (B, 1, Tq) transpose done once in the wrapper
    # (effectively free) instead of an XLU shuffle per grid step.
    sim = jnp.transpose(sim_raw, (0, 2, 1))
    return att, sim


if __name__ == "__main__":
    key = jax.random.PRNGKey(0)
    kq, ky = jax.random.split(key)
    B, Tq, Ty, D = 2, 8, 8, 32
    query = jax.random.normal(kq, (B, Tq, D), dtype=jnp.float32)
    y = jax.random.normal(ky, (B, Ty, D), dtype=jnp.float32)

    att, sim = att_dot(query, y)
    jax.block_until_ready((att, sim))

    # reference check in plain JAX (mirrors torch.bmm + max(2).unsqueeze(1))
    att_ref = jnp.einsum("bqd,bkd->bqk", query, y)
    sim_ref = jnp.max(att_ref, axis=2)[:, None, :]
    assert att.shape == (B, Tq, Ty) and sim.shape == (B, 1, Tq)
    assert jnp.allclose(att, att_ref, atol=1e-5)
    assert jnp.allclose(sim, sim_ref, atol=1e-5)

    print("KERNEL_OK")
</pallas_src>

<mosaic_0001>
module attributes {stable_mosaic.version = 11 : i64} {
  func.func @attdot_kernel(%arg0: i32, %arg1: i32, %arg2: i32, %arg3: i32, %arg4: memref<2x8x32xf32, #tpu.memory_space<vmem>>, %arg5: memref<2x8x32xf32, #tpu.memory_space<vmem>>, %arg6: memref<2x8x8xf32, #tpu.memory_space<vmem>>, %arg7: memref<2x8x1xf32, #tpu.memory_space<vmem>>) attributes {dimension_semantics = [#tpu.dimension_semantics<parallel>, #tpu.dimension_semantics<parallel>, #tpu.dimension_semantics<arbitrary>, #tpu.dimension_semantics<arbitrary>], iteration_bounds = array<i64: 1, 1, 1, 1>, scalar_prefetch = 0 : i64, scratch_operands = 0 : i64, tpu.core_type = #tpu.core_type<tc>, window_params = [{transform_indices = @transform_0, window_bounds = array<i64: 2, 8, 32>}, {transform_indices = @transform_1, window_bounds = array<i64: 2, 8, 32>}, {transform_indices = @transform_2, window_bounds = array<i64: 2, 8, 8>}, {transform_indices = @transform_3, window_bounds = array<i64: 2, 8, 1>}]} {
    %c0 = arith.constant 0 : index
    %c0_0 = arith.constant 0 : index
    %c0_1 = arith.constant 0 : index
    %0 = vector.load %arg4[%c0, %c0_0, %c0_1] : memref<2x8x32xf32, #tpu.memory_space<vmem>>, vector<2x8x32xf32>
    %c0_2 = arith.constant 0 : index
    %c0_3 = arith.constant 0 : index
    %c0_4 = arith.constant 0 : index
    %1 = vector.load %arg5[%c0_2, %c0_3, %c0_4] : memref<2x8x32xf32, #tpu.memory_space<vmem>>, vector<2x8x32xf32>
    "tpu.trace_start"() <{level = 10 : i32, message = "bqd,bkd->bqk"}> : () -> ()
    %cst = arith.constant dense<0.000000e+00> : vector<2x8x8xf32>
    %2 = tpu.matmul %0, %1, %cst {dimension_numbers = #tpu.dot_dimension_numbers<[2], [2], [1], [1], [0, 0, 0, 1, 1, 1], [0], [0]>} : vector<2x8x32xf32>, vector<2x8x32xf32>, vector<2x8x8xf32> -> vector<2x8x8xf32>
    %c0_i32 = arith.constant 0 : i32
    "tpu.trace_stop"() : () -> ()
    %3 = arith.cmpi eq, %arg3, %c0_i32 : i32
    %4 = arith.extui %3 : i1 to i32
    %c0_i32_5 = arith.constant 0 : i32
    %5 = arith.cmpi ne, %4, %c0_i32_5 : i32
    scf.if %5 {
      %c0_13 = arith.constant 0 : index
      %c0_14 = arith.constant 0 : index
      %c0_15 = arith.constant 0 : index
      %18 = vector.load %arg6[%c0_13, %c0_14, %c0_15] : memref<2x8x8xf32, #tpu.memory_space<vmem>>, vector<2x8x8xf32>
      tpu.vector_store %arg6[%c0_13, %c0_14, %c0_15], %2 {strides = array<i32>} : memref<2x8x8xf32, #tpu.memory_space<vmem>>, vector<2x8x8xf32>,
    } else {
    }
    %c0_i32_6 = arith.constant 0 : i32
    %6 = arith.cmpi sgt, %arg3, %c0_i32_6 : i32
    %7 = arith.extui %6 : i1 to i32
    %c0_i32_7 = arith.constant 0 : i32
    %8 = arith.cmpi ne, %7, %c0_i32_7 : i32
    scf.if %8 {
      %c0_13 = arith.constant 0 : index
      %c0_14 = arith.constant 0 : index
      %c0_15 = arith.constant 0 : index
      %18 = vector.load %arg6[%c0_13, %c0_14, %c0_15] : memref<2x8x8xf32, #tpu.memory_space<vmem>>, vector<2x8x8xf32>
      %19 = arith.addf %18, %2 : vector<2x8x8xf32>
      %c0_16 = arith.constant 0 : index
      %c0_17 = arith.constant 0 : index
      %c0_18 = arith.constant 0 : index
      %20 = vector.load %arg6[%c0_16, %c0_17, %c0_18] : memref<2x8x8xf32, #tpu.memory_space<vmem>>, vector<2x8x8xf32>
      tpu.vector_store %arg6[%c0_16, %c0_17, %c0_18], %19 {strides = array<i32>} : memref<2x8x8xf32, #tpu.memory_space<vmem>>, vector<2x8x8xf32>,
    } else {
    }
    %c0_i32_8 = arith.constant 0 : i32
    %9 = arith.cmpi eq, %arg3, %c0_i32_8 : i32
    %c0_i32_9 = arith.constant 0 : i32
    %10 = arith.cmpi eq, %arg2, %c0_i32_9 : i32
    %11 = arith.andi %9, %10 : i1
    %12 = arith.extui %11 : i1 to i32
    %c0_i32_10 = arith.constant 0 : i32
    %13 = arith.cmpi ne, %12, %c0_i32_10 : i32
    scf.if %13 {
      %c0_13 = arith.constant 0 : index
      %c0_14 = arith.constant 0 : index
      %c0_15 = arith.constant 0 : index
      %18 = vector.load %arg6[%c0_13, %c0_14, %c0_15] : memref<2x8x8xf32, #tpu.memory_space<vmem>>, vector<2x8x8xf32>
      %cst_16 = arith.constant dense<0xFF800000> : vector<2x8xf32>
      %19 = vector.multi_reduction <maximumf>, %18, %cst_16 [2] : vector<2x8x8xf32> to vector<2x8xf32>
      %20 = vector.shape_cast %19 : vector<2x8xf32> to vector<2x8x1xf32>
      %c0_17 = arith.constant 0 : index
      %c0_18 = arith.constant 0 : index
      %c0_19 = arith.constant 0 : index
      %21 = vector.load %arg7[%c0_17, %c0_18, %c0_19] : memref<2x8x1xf32, #tpu.memory_space<vmem>>, vector<2x8x1xf32>
      tpu.vector_store %arg7[%c0_17, %c0_18, %c0_19], %20 {strides = array<i32>} : memref<2x8x1xf32, #tpu.memory_space<vmem>>, vector<2x8x1xf32>,
    } else {
    }
    %c0_i32_11 = arith.constant 0 : i32
    %14 = arith.cmpi sgt, %arg2, %c0_i32_11 : i32
    %15 = arith.andi %9, %14 : i1
    %16 = arith.extui %15 : i1 to i32
    %c0_i32_12 = arith.constant 0 : i32
    %17 = arith.cmpi ne, %16, %c0_i32_12 : i32
    scf.if %17 {
      %c0_13 = arith.constant 0 : index
      %c0_14 = arith.constant 0 : index
      %c0_15 = arith.constant 0 : index
      %18 = vector.load %arg7[%c0_13, %c0_14, %c0_15] : memref<2x8x1xf32, #tpu.memory_space<vmem>>, vector<2x8x1xf32>
      %c0_16 = arith.constant 0 : index
      %c0_17 = arith.constant 0 : index
      %c0_18 = arith.constant 0 : index
      %19 = vector.load %arg6[%c0_16, %c0_17, %c0_18] : memref<2x8x8xf32, #tpu.memory_space<vmem>>, vector<2x8x8xf32>
      %cst_19 = arith.constant dense<0xFF800000> : vector<2x8xf32>
      %20 = vector.multi_reduction <maximumf>, %19, %cst_19 [2] : vector<2x8x8xf32> to vector<2x8xf32>
      %21 = vector.shape_cast %20 : vector<2x8xf32> to vector<2x8x1xf32>
      %22 = arith.maximumf %18, %21 : vector<2x8x1xf32>
      %c0_20 = arith.constant 0 : index
      %c0_21 = arith.constant 0 : index
      %c0_22 = arith.constant 0 : index
      %23 = vector.load %arg7[%c0_20, %c0_21, %c0_22] : memref<2x8x1xf32, #tpu.memory_space<vmem>>, vector<2x8x1xf32>
      tpu.vector_store %arg7[%c0_20, %c0_21, %c0_22], %22 {strides = array<i32>} : memref<2x8x1xf32, #tpu.memory_space<vmem>>, vector<2x8x1xf32>,
    } else {
    }
    return
  }
  func.func @transform_0(%arg0: i32, %arg1: i32, %arg2: i32, %arg3: i32) -> (i32, i32, i32) {
    %c0_i32 = arith.constant 0 : i32
    return %arg0, %arg1, %arg3 : i32, i32, i32
  }
  func.func @transform_1(%arg0: i32, %arg1: i32, %arg2: i32, %arg3: i32) -> (i32, i32, i32) {
    %c0_i32 = arith.constant 0 : i32
    return %arg0, %arg2, %arg3 : i32, i32, i32
  }
  func.func @transform_2(%arg0: i32, %arg1: i32, %arg2: i32, %arg3: i32) -> (i32, i32, i32) {
    %c0_i32 = arith.constant 0 : i32
    return %arg0, %arg1, %arg2 : i32, i32, i32
  }
  func.func @transform_3(%arg0: i32, %arg1: i32, %arg2: i32, %arg3: i32) -> (i32, i32, i32) {
    %c0_i32 = arith.constant 0 : i32
    %c0_i32_0 = arith.constant 0 : i32
    return %arg0, %arg1, %c0_i32 : i32, i32, i32
  }
}

</mosaic_0001>

<bundles_post_ra>
// kernel: tpu_custom_call.1
= control target key start
LH: loop header
LB: loop body
LE: loop exit
PB: predicated region body
PF: predicated region fallthrough
CT: control target
= control target key end

     0   :  { %9 = vsyncpa [#allocation3], 0  ;;  %s452_s0 = inlined_call_operand.hbm [shape: f32[2,8,32], index: 0, kind: input, shape index: {}]   ;;  %s453_s1 = inlined_call_operand.hbm [shape: f32[2,8,32], index: 1, kind: input, shape index: {}]   ;;  %s454_s2 = inlined_call_operand.hbm [shape: f32[2,8,8], index: 2, kind: output, shape index: {0}]   ;;  %s455_s3 = inlined_call_operand.vmem [shape: f32[2,8,1], index: 3, kind: output, shape index: {1}]  }
   0x1   :  { %10 = vsyncpa [#allocation6], 0 }
   0x2   :  { %11 = vsyncpa [#allocation4], 0  ;;  %s374_s12 = smov [#allocation2]   ;;  %s302_s16 = scalar_lea.hbm %s452_s0, 256 }
   0x3   :  { %s17_s13 = sshll.u32 %s374_s12, 4  ;;  %p303_p0 = scmp.ne.s32.totalorder %s452_s0, %s302_s16  ;;  %s18_s13 = int_to_ptr.vmem [resolvable:$true] %s17_s13 }
   0x4   :  { %p306_p1 = scmp.lt.u32.totalorder %s302_s16, %s452_s0 }
   0x6   :  { %p308_p2 = pnand %p306_p1, %p303_p0 }
   0x8   :  { %311 = shalt.err (!%p308_p2)
}
   0x9   :  { %s312_s21 = scalar_lea.vmem %s18_s13, 256  ;;  %p317_p4 = scmp.lt.s32.totalorder %s18_s13, %s18_s13 }
   0xa   :  { %p313_p3 = scmp.ne.s32.totalorder %s18_s13, %s312_s21  ;;  %p318_p5 = scmp.lt.s32.totalorder %s312_s21, %s312_s21 }
   0xc   :  { %p319_p6 = por %p318_p5, %p317_p4 }
   0xe   :  { %p320_p7 = pnand %p319_p6, %p313_p3 }
  0x10   :  { %323 = shalt.err (!%p320_p7)
}
  0x11   :  { %s375_s22 = smov 128   ;;  %s376_s23 = smov 8  }
  0x12   :  { %23 = dma.hbm_to_vmem [thread:$0]  %s452_s0, 256, %s18_s13, [#allocation3], %s375_s22, %s375_s22, %s376_s23  }
  0x13   :  { %s377_s26 = smov [#allocation5]   ;;  %s324_s30 = scalar_lea.hbm %s453_s1, 256 }
  0x14   :  { %s29_s27 = sshll.u32 %s377_s26, 4  ;;  %p325_p8 = scmp.ne.s32.totalorder %s453_s1, %s324_s30  ;;  %s30_s27 = int_to_ptr.vmem [resolvable:$true] %s29_s27 }
  0x15   :  { %p328_p9 = scmp.lt.u32.totalorder %s324_s30, %s453_s1 }
  0x17   :  { %p330_p10 = pnand %p328_p9, %p325_p8 }
  0x19   :  { %333 = shalt.err (!%p330_p10)
}
  0x1a   :  { %s334_s8 = scalar_lea.vmem %s30_s27, 256  ;;  %p339_p12 = scmp.lt.s32.totalorder %s30_s27, %s30_s27 }
  0x1b   :  { %p335_p11 = scmp.ne.s32.totalorder %s30_s27, %s334_s8  ;;  %p340_p13 = scmp.lt.s32.totalorder %s334_s8, %s334_s8 }
  0x1d   :  { %p341_p0 = por %p340_p13, %p339_p12 }
  0x1f   :  { %p342_p1 = pnand %p341_p0, %p335_p11 }
  0x21   :  { %345 = shalt.err (!%p342_p1)
}
  0x22   :  { %35 = dma.hbm_to_vmem [thread:$0]  %s453_s1, 256, %s30_s27, [#allocation6], %s375_s22, %s375_s22, %s376_s23  }
  0x23   :  { %368 = dma.done.wait [#allocation3], 256  }
  0x24   :  { %369 = vsyncadd [#allocation3], 4294967040 }
  0x25   :  { %370 = dma.done.wait [#allocation6], 256  }
  0x26   :  { %371 = vsyncadd [#allocation6], 4294967040  ;;  %v378_v0 = vmov 0.0   ;;  %vm379_vm0 = vmmov 0   ;;  %vm46_vm1 = vcmask 261120   ;;  %v44_v1 = vld [vmem:[#allocation5] sm:$0xff] }
  0x27   :  { %285 = vmatprep.subr.mxu0 %v378_v0  ;;  %287 = vmatprep.mubr.msk.f32.mxu0 %vm379_vm0, %v378_v0  ;;  %v45_v2 = vld [vmem:[#allocation5 + $0x8] sm:$0xff]  ;;  %v42_v3 = vld [vmem:[#allocation2] sm:$0xff]  ;;  %v43_v4 = vld [vmem:[#allocation2 + $0x8] sm:$0xff]  ;;  %vm203_vm2 = vcmask 64512   ;;  %s380_s1 = smov [#allocation7]  }
  0x28   :  { %290 = vmatprep.subr.mxu1 %v378_v0  ;;  %292 = vmatprep.mubr.msk.f32.mxu1 %vm379_vm0, %v378_v0  ;;  %s260_s10 = sshll.u32 %s380_s1, 4  ;;  %s261_s10 = int_to_ptr.vmem [resolvable:$true] %s260_s10 }
  0x29   :  { %286 = vmatpush3.xpose.msk.msra.mxu0 %vm46_vm1, %v44_v1  ;;  %291 = vmatpush3.xpose.msk.msra.mxu1 %vm46_vm1, %v45_v2  ;;  %s346_s11 = scalar_lea.vmem %s261_s10, 256  ;;  %p351_p3 = scmp.lt.s32.totalorder %s261_s10, %s261_s10 }
  0x2a   :  { %p347_p2 = scmp.ne.s32.totalorder %s261_s10, %s346_s11  ;;  %p352_p4 = scmp.lt.s32.totalorder %s346_s11, %s346_s11 }
  0x2c   :  { %288 = vmatmul.mubr.msk.f32.vlgmr.msra.gmra.mrb[0].mxu0 %vm46_vm1, %v42_v3  ;;  %293 = vmatmul.mubr.msk.f32.vlgmr.msra.gmra.mrb[0].mxu1 %vm46_vm1, %v43_v4  ;;  %p353_p5 = por %p352_p4, %p351_p3 }
  0x2e   :  { %p354_p6 = pnand %p353_p5, %p347_p2 }
  0xff   :  { %v119_v5 = vpop.f32.mrb[0].mxu0  ;;  %v195_v6 = vpop.f32.mrb[0].mxu1 }
 0x100   :  { %204 = vst.msk [vmem:[#allocation7] sm:$0xff] %vm203_vm2, %v119_v5  ;;  %v289_v7 = vpop.f32.mrb[1].mxu0  ;;  %205 = vst.msk [vmem:[#allocation7 + $0x8] sm:$0xff] %vm203_vm2, %v195_v6  ;;  %v294_v8 = vpop.f32.mrb[1].mxu1 }
 0x107   :  { %v222_v9 = vld [vmem:[#allocation7] sm:$0xff]  ;;  %v223_v10 = vld [vmem:[#allocation7 + $0x8] sm:$0xff] }
 0x108   :  { %v225_v11 = vsel %vm203_vm2, %v222_v9, -inf  ;;  %v228_v12 = vsel %vm203_vm2, %v223_v10, -inf }
 0x109   :  { %226 = vmax.xlane.f32.xlu0 %v225_v11 }
 0x10d   :  { %229 = vmax.xlane.f32.xlu0 %v228_v12 }
 0x10e   :  { %357 = shalt.err (!%p354_p6)
}
 0x10f   :  { %s358_s14 = scalar_lea.hbm %s454_s2, 256 }
 0x110   :  { %p359_p7 = scmp.ne.s32.totalorder %s454_s2, %s358_s14  ;;  %p362_p8 = scmp.lt.u32.totalorder %s358_s14, %s454_s2 }
 0x112   :  { %p364_p9 = pnand %p362_p8, %p359_p7 }
 0x114   :  { %367 = shalt.err (!%p364_p9)
}
 0x115   :  { %266 = dma.vmem_to_hbm [thread:$0]  %s261_s10, 256, %s454_s2, [#allocation4], %s375_s22, %s375_s22, %s376_s23   ;;  %vm231_vm3 = vcmask 7168  }
 0x196   :  { %v227_v13 = vpop.xlane.xlu0 %226 }
 0x197   :  { %232 = vst.msk [vmem:[%s455_s3] sm:$0xff] %vm231_vm3, %v227_v13 }
 0x19a   :  { %v230_v14 = vpop.xlane.xlu0 %229 }
 0x19b   :  { %233 = vst.msk [vmem:[%s455_s3 + $0x8] sm:$0xff] %vm231_vm3, %v230_v14 }
 0x19c   :  { %372 = dma.done.wait [#allocation4], 256  }
 0x19d   :  { %373 = vsyncadd [#allocation4], 4294967040 }
 0x19e   :  { %274 = vsyncpa [#allocation3], 1 }
 0x19f   :  { %275 = vsyncpa [#allocation6], 1 }
 0x1a0   :  { %276 = vsyncpa [#allocation4], 1 }

</bundles_post_ra>
